<compile_context>
chip_gen: v7x
topology: tpu7x:2x2x1
jax: 0.10.0
libtpu: 0.0.40
codegen_flags: <defaults>
</compile_context>

<pallas_src>
import jax
import jax.numpy as jnp
from jax.experimental import pallas as pl
from jax.experimental.pallas import tpu as pltpu


# ----------------------------------------------------------------------------
# Small helpers
# ----------------------------------------------------------------------------
def _round_up(x, m):
    return (x + m - 1) // m * m


def _pick_tile(nrows, max_tile=1024, min_steps=8, align=32):
    """Row tile: multiple of `align`, >= min_steps grid steps when possible."""
    t = _round_up(max(1, -(-nrows // min_steps)), align)
    return int(max(align, min(max_tile, t)))


def _pad_rows(a, tile):
    p = (-a.shape[0]) % tile
    if p:
        a = jnp.pad(a, ((0, p),) + ((0, 0),) * (a.ndim - 1))
    return a


def _block_diag(w, n):
    cin, cout = w.shape
    out = jnp.zeros((n * cin, n * cout), w.dtype)
    for i in range(n):
        out = out.at[i * cin:(i + 1) * cin, i * cout:(i + 1) * cout].set(w)
    return out


def _prefer_blockdiag():
    """192-wide block-diag shared stack on v6e/v7x; per-pyramid on v5 chips."""
    try:
        kind = jax.devices()[0].device_kind.lower()
    except Exception:
        return True
    return "v5" not in kind


def _cparams():
    return pltpu.CompilerParams(dimension_semantics=("parallel",),
                                vmem_limit_bytes=32 * 1024 * 1024)


def _nbytes(a):
    return int(a.size) * a.dtype.itemsize


# ----------------------------------------------------------------------------
# Pallas kernels
# ----------------------------------------------------------------------------
def _make_feature_kernel(n_pyr, cin, use_blockdiag):
    """Fused MSFeature: shared stack (per pyramid or block-diag) -> feature."""

    def kernel(x_ref, m_ref, *rest):
        (sw1, sb1, sw2, sb2, sw3, sb3,
         fw1, fb1, fw2, fb2, fw3, fb3, o_ref) = rest

        def layer(h, w_ref, b_ref, relu):
            # bf16 MXU matmul with f32 accumulation.
            y = jnp.dot(h.astype(jnp.bfloat16), w_ref[...],
                        preferred_element_type=jnp.float32) + b_ref[...]
            return jnp.maximum(y, 0.0) if relu else y

        x = x_ref[...]                                   # (tile, n_pyr*cin) bf16
        if use_blockdiag:
            # Block-diagonal weights == independent per-pyramid transforms,
            # output columns already in torch.cat(fs, dim=1) order.
            h = layer(x, sw1, sb1, True)
            h = layer(h, sw2, sb2, True)
            f = layer(h, sw3, sb3, False)                # (tile, n_pyr*16)
        else:
            parts = []
            for i in range(n_pyr):
                xi = x[:, i * cin:(i + 1) * cin]
                h = layer(xi, sw1, sb1, True)
                h = layer(h, sw2, sb2, True)
                parts.append(layer(h, sw3, sb3, False))
            f = jnp.concatenate(parts, axis=-1)          # (tile, n_pyr*16)

        h = layer(f, fw1, fb1, True)
        h = layer(h, fw2, fb2, True)
        y = layer(h, fw3, fb3, False)
        # Single mask multiply (exact for binary {0,1} masks).
        o_ref[...] = (y * m_ref[...]).astype(o_ref.dtype)

    return kernel


def _sampler_kernel(f_ref, w1, b1, w2, b2, w3, b3, w4, b4, p_ref):
    """sampler: 4 pointwise Conv1d layers (ReLU x3) + softmax over pyramids."""

    def layer(h, w_ref, b_ref, relu):
        y = jnp.dot(h.astype(jnp.bfloat16), w_ref[...],
                    preferred_element_type=jnp.float32) + b_ref[...]
        return jnp.maximum(y, 0.0) if relu else y

    h = layer(f_ref[...], w1, b1, True)
    h = layer(h, w2, b2, True)
    h = layer(h, w3, b3, True)
    logits = layer(h, w4, b4, False)                     # (tile, n_pyr)
    lmax = jnp.max(logits, axis=-1, keepdims=True)
    e = jnp.exp(logits - lmax)
    s = jnp.sum(e, axis=-1, keepdims=True)
    p_ref[...] = (e * pl.reciprocal(s, approx=True)).astype(p_ref.dtype)


def _make_blend_kernel(n_pyr, c):
    """Lane-dense blend: 2 pixels per row; out[:, h*c:(h+1)*c] = sum_i w*x."""

    def kernel(ws_ref, x_ref, o_ref):
        ws = ws_ref[...]                                 # (tile, 2*n_pyr) f32
        x = x_ref[...].astype(jnp.float32)               # (tile, 2*n_pyr*c)
        halves = []
        for h in range(2):
            col = h * n_pyr
            acc = ws[:, col:col + 1] * x[:, col * c:(col + 1) * c]
            for i in range(1, n_pyr):
                acc = acc + (ws[:, col + i:col + i + 1]
                             * x[:, (col + i) * c:(col + i + 1) * c])
            halves.append(acc)
        o_ref[...] = jnp.concatenate(halves, axis=-1).astype(o_ref.dtype)

    return kernel


# ----------------------------------------------------------------------------
# Pallas wrappers
# ----------------------------------------------------------------------------
def _row_spec(cols, tile):
    return pl.BlockSpec((tile, cols), lambda i: (i, 0))


def _const_spec(a):
    return pl.BlockSpec(a.shape, lambda i: (0, 0))


def _pack_feature_weights(params, n_pyr, use_blockdiag):
    sh = list(params["shared"])                          # [w1,b1,w2,b2,w3,b3]
    ft = list(params["feature"])
    if use_blockdiag:
        packed = []
        for w, b in zip(sh[0::2], sh[1::2]):
            packed += [_block_diag(w, n_pyr),
                       jnp.concatenate([b] * n_pyr, axis=1)]
        sh = packed
    flat = sh + ft
    # weights -> bf16 for the MXU; biases stay f32 (added to f32 accumulators)
    return [a.astype(jnp.bfloat16) if i % 2 == 0 else a.astype(jnp.float32)
            for i, a in enumerate(flat)]


def fused_feature(x_cat, mask_pc, wts, *, n_pyr, cin, tile, use_blockdiag):
    """x_cat: (P_pad, n_pyr*cin) bf16; mask_pc: (P_pad, 1) f32 -> (P_pad, 48) bf16."""
    P_pad, ctot = x_cat.shape
    assert P_pad % tile == 0
    cout = wts[-2].shape[1]

    shared_mm = sum(int(w.shape[0] * w.shape[1]) for w in wts[0:6:2])
    feat_mm = sum(int(w.shape[0] * w.shape[1]) for w in wts[6::2])
    mult = 1 if use_blockdiag else n_pyr
    flops = 2 * P_pad * (mult * shared_mm + feat_mm)
    bytes_accessed = (_nbytes(x_cat) + _nbytes(mask_pc) + P_pad * cout * 2
                      + sum(_nbytes(a) for a in wts))

    return pl.pallas_call(
        _make_feature_kernel(n_pyr, cin, use_blockdiag),
        out_shape=jax.ShapeDtypeStruct((P_pad, cout), jnp.bfloat16),
        grid=(P_pad // tile,),
        in_specs=([_row_spec(ctot, tile), _row_spec(1, tile)]
                  + [_const_spec(a) for a in wts]),
        out_specs=_row_spec(cout, tile),
        compiler_params=_cparams(),
        cost_estimate=pl.CostEstimate(flops=flops, transcendentals=0,
                                      bytes_accessed=bytes_accessed),
    )(x_cat, mask_pc, *wts)


def sampler_mlp(f, sampler_params, n_pyr, cin_pad, *, tile):
    """f: (R_pad, cin_pad) bf16 -> softmax probs (R_pad, n_pyr) f32."""
    R, cin = f.shape
    assert R % tile == 0 and cin == cin_pad
    flat = []
    for li, (w, b) in enumerate(sampler_params):
        if li == 0 and w.shape[0] != cin_pad:            # 49 -> 64 channel pad
            w = jnp.pad(w, ((0, cin_pad - w.shape[0]), (0, 0)))
        flat += [w.astype(jnp.bfloat16), b.astype(jnp.float32)]

    flops = 2 * R * sum(int(w.shape[0] * w.shape[1]) for w in flat[0::2])
    bytes_accessed = _nbytes(f) + R * n_pyr * 4 + sum(_nbytes(a) for a in flat)

    return pl.pallas_call(
        _sampler_kernel,
        out_shape=jax.ShapeDtypeStruct((R, n_pyr), jnp.float32),
        grid=(R // tile,),
        in_specs=[_row_spec(cin, tile)] + [_const_spec(a) for a in flat],
        out_specs=_row_spec(n_pyr, tile),
        compiler_params=_cparams(),
        cost_estimate=pl.CostEstimate(flops=flops,
                                      transcendentals=R * (n_pyr + 1),
                                      bytes_accessed=bytes_accessed),
    )(f, *flat)


def blend_pyramids(ws2, x2, n_pyr, c, *, tile):
    """ws2: (Ph, 2*n_pyr) f32, x2: (Ph, 2*n_pyr*c) bf16 -> (Ph, 2*c) f32."""
    Ph, wcols = ws2.shape
    assert Ph % tile == 0 and wcols == 2 * n_pyr
    assert x2.shape == (Ph, 2 * n_pyr * c)
    flops = Ph * 2 * n_pyr * c * 2
    bytes_accessed = _nbytes(x2) + _nbytes(ws2) + Ph * 2 * c * 4

    return pl.pallas_call(
        _make_blend_kernel(n_pyr, c),
        out_shape=jax.ShapeDtypeStruct((Ph, 2 * c), jnp.float32),
        grid=(Ph // tile,),
        in_specs=[_row_spec(2 * n_pyr, tile), _row_spec(2 * n_pyr * c, tile)],
        out_specs=_row_spec(2 * c, tile),
        compiler_params=_cparams(),
        cost_estimate=pl.CostEstimate(flops=flops, transcendentals=0,
                                      bytes_accessed=bytes_accessed),
    )(ws2, x2)


# ----------------------------------------------------------------------------
# Glue (plain JAX): layout plumbing, gather/scatter by yi, dsda
# ----------------------------------------------------------------------------
def _det3(m):
    return (m[0, 0] * (m[1, 1] * m[2, 2] - m[1, 2] * m[2, 1])
            - m[0, 1] * (m[1, 0] * m[2, 2] - m[1, 2] * m[2, 0])
            + m[0, 2] * (m[1, 0] * m[2, 1] - m[1, 1] * m[2, 0]))


def calc_dsda_projective(sizes, m):
    H, W = sizes
    ys, xs = jnp.meshgrid(jnp.arange(H, dtype=jnp.float32),
                          jnp.arange(W, dtype=jnp.float32), indexing="ij")
    w = m[2, 0] * xs + m[2, 1] * ys + m[2, 2]
    det = jnp.abs(_det3(m))
    dsda = det / (jnp.abs(w) ** 3 + 1e-12)
    return dsda.reshape(-1)                              # (H*W,)


def adaptive_ms_sampler(xs, mask, grid, yi, m, sizes, params, *, max_tile=1024):
    """Forward pass of AdaptiveMSSampler. Returns (B, C, H, W)."""
    del grid  # unused by the reference forward as well
    B, C, H, W = xs[0].shape
    n_pyr = len(xs)
    P = B * H * W
    use_blockdiag = _prefer_blockdiag()

    # Row tile (multiple of 32 so the blend half-tile is bf16-friendly).
    T = _pick_tile(P, max_tile=max_tile, min_steps=8, align=32)

    # --- single fused channels-last transform, bf16, pyramid-concatenated ----
    xst = jnp.stack(xs, axis=0)                          # (n, B, C, H, W)
    x_cat = jnp.transpose(xst, (1, 3, 4, 0, 2)).reshape(P, n_pyr * C)
    x_cat = _pad_rows(x_cat.astype(jnp.bfloat16), T)     # (P_pad, n*C) bf16
    P_pad = x_cat.shape[0]

    mask_pc = jnp.broadcast_to(mask.reshape(1, H * W, 1),
                               (B, H * W, 1)).reshape(P, 1).astype(jnp.float32)
    mask_pc = _pad_rows(mask_pc, T)

    # --- fused MSFeature (shared stacks -> concat -> feature), one kernel ----
    wts = _pack_feature_weights(params, n_pyr, use_blockdiag)
    f = fused_feature(x_cat, mask_pc, wts, n_pyr=n_pyr, cin=C, tile=T,
                      use_blockdiag=use_blockdiag)       # (P_pad, 48) bf16

    # --- gather masked positions, append log(dsda) ----------------------------
    N = yi.shape[0]
    f = f[:P].reshape(B, H * W, -1)[:, yi, :]            # (B, N, 48) bf16
    dsda = calc_dsda_projective(sizes, m)[yi]
    dsda = jnp.log(dsda + 1e-08).astype(jnp.bfloat16)
    dsda = jnp.broadcast_to(dsda.reshape(1, N, 1), (B, N, 1))
    fcat = jnp.concatenate([f, dsda], axis=-1)           # (B, N, 49) bf16

    # --- sampler + softmax over pyramids (channel pad 49 -> 64) ---------------
    cin = fcat.shape[-1]
    cin_pad = _round_up(cin, 64)
    Ts = _pick_tile(B * N, max_tile=max_tile, min_steps=8, align=32)
    fflat = jnp.pad(fcat.reshape(B * N, cin), ((0, 0), (0, cin_pad - cin)))
    fflat = _pad_rows(fflat, Ts)
    p = sampler_mlp(fflat, params["sampler"], n_pyr, cin_pad, tile=Ts)[:B * N]
    p = p.reshape(B, N, n_pyr)

    # --- scatter back to full grid, lane-dense blend (2 pixels / row) ---------
    ws = jnp.zeros((B, H * W, n_pyr), jnp.float32).at[:, yi, :].set(p)
    ws2 = _pad_rows(ws.reshape(P, n_pyr), T).reshape(P_pad // 2, 2 * n_pyr)
    x2 = x_cat.reshape(P_pad // 2, 2 * n_pyr * C)
    out2 = blend_pyramids(ws2, x2, n_pyr, C, tile=T // 2)  # (P_pad//2, 2C) f32
    out_pc = out2.reshape(P_pad, C)[:P]
    return jnp.transpose(out_pc.reshape(B, H, W, C), (0, 3, 1, 2))


# ----------------------------------------------------------------------------
# Deterministic parameter init (shapes from the module's __init__)
# ----------------------------------------------------------------------------
def _init_linear(key, cin, cout):
    kw, kb = jax.random.split(key)
    w = jax.random.normal(kw, (cin, cout), jnp.float32) * (1.0 / jnp.sqrt(cin))
    b = jax.random.normal(kb, (1, cout), jnp.float32) * 0.01
    return w, b


def init_params(key, n_pyramids=3, n_feats=16, ms_feats=64):
    n_feats_ex = n_pyramids * n_feats                    # 48
    keys = jax.random.split(key, 16)
    # MSFeature.shared : MaskedSequential(64, 64, 16, depth=3)
    shared = [*_init_linear(keys[0], ms_feats, ms_feats),
              *_init_linear(keys[1], ms_feats, ms_feats),
              *_init_linear(keys[2], ms_feats, n_feats)]
    # MSFeature.feature : MaskedSequential(48, 48, 48, depth=3)
    feature = [*_init_linear(keys[3], n_feats_ex, n_feats_ex),
               *_init_linear(keys[4], n_feats_ex, n_feats_ex),
               *_init_linear(keys[5], n_feats_ex, n_feats_ex)]
    # sampler : Conv1d(49,48) ReLU Conv1d(48,48) ReLU Conv1d(48,48) ReLU Conv1d(48,3)
    sampler = [_init_linear(keys[6], 1 + n_feats_ex, n_feats_ex),
               _init_linear(keys[7], n_feats_ex, n_feats_ex),
               _init_linear(keys[8], n_feats_ex, n_feats_ex),
               _init_linear(keys[9], n_feats_ex, n_pyramids)]
    return {"shared": shared, "feature": feature, "sampler": sampler}


# ----------------------------------------------------------------------------
if __name__ == "__main__":
    key = jax.random.PRNGKey(0)
    n_pyramids = 3
    B, C, H, W = 2, 64, 16, 16
    sizes = (H, W)

    kx, kp = jax.random.split(key)
    xkeys = jax.random.split(kx, n_pyramids)
    xs = [jax.random.normal(k, (B, C, H, W), jnp.float32) for k in xkeys]

    # checkerboard mask -> N = H*W/2 masked positions
    ii, jj = jnp.meshgrid(jnp.arange(H), jnp.arange(W), indexing="ij")
    mask = ((ii + jj) % 2 == 0).astype(jnp.float32).reshape(1, 1, H, W)
    yi = jnp.nonzero(mask.reshape(-1))[0]                # (N,), N = 128
    grid = jnp.zeros((2, yi.shape[0]), jnp.float32)      # unused by forward
    m = jnp.array([[1.0, 0.02, 0.5],
                   [0.01, 1.0, -0.3],
                   [0.001, 0.002, 1.0]], jnp.float32)

    params = init_params(kp, n_pyramids=n_pyramids, n_feats=16, ms_feats=C)

    out = adaptive_ms_sampler(xs, mask, grid, yi, m, sizes, params)
    out = jax.block_until_ready(out)
    assert out.shape == (B, C, H, W), out.shape
    assert bool(jnp.all(jnp.isfinite(out)))
    print("KERNEL_OK")
</pallas_src>

<mosaic_0001>
module attributes {stable_mosaic.version = 11 : i64} {
  func.func @kernel(%arg0: i32, %arg1: memref<64x192xbf16, #tpu.memory_space<vmem>>, %arg2: memref<64x1xf32, #tpu.memory_space<vmem>>, %arg3: memref<192x192xbf16, #tpu.memory_space<vmem>>, %arg4: memref<1x192xf32, #tpu.memory_space<vmem>>, %arg5: memref<192x192xbf16, #tpu.memory_space<vmem>>, %arg6: memref<1x192xf32, #tpu.memory_space<vmem>>, %arg7: memref<192x48xbf16, #tpu.memory_space<vmem>>, %arg8: memref<1x48xf32, #tpu.memory_space<vmem>>, %arg9: memref<48x48xbf16, #tpu.memory_space<vmem>>, %arg10: memref<1x48xf32, #tpu.memory_space<vmem>>, %arg11: memref<48x48xbf16, #tpu.memory_space<vmem>>, %arg12: memref<1x48xf32, #tpu.memory_space<vmem>>, %arg13: memref<48x48xbf16, #tpu.memory_space<vmem>>, %arg14: memref<1x48xf32, #tpu.memory_space<vmem>>, %arg15: memref<64x48xbf16, #tpu.memory_space<vmem>>) attributes {dimension_semantics = [#tpu.dimension_semantics<parallel>], iteration_bounds = array<i64: 8>, scalar_prefetch = 0 : i64, scratch_operands = 0 : i64, tpu.core_type = #tpu.core_type<tc>, window_params = [{transform_indices = @transform_0, window_bounds = array<i64: 64, 192>}, {transform_indices = @transform_1, window_bounds = array<i64: 64, 1>}, {pipeline_mode = #tpu.pipeline_mode<synchronous>, transform_indices = @transform_2, window_bounds = array<i64: 192, 192>}, {pipeline_mode = #tpu.pipeline_mode<synchronous>, transform_indices = @transform_3, window_bounds = array<i64: 1, 192>}, {pipeline_mode = #tpu.pipeline_mode<synchronous>, transform_indices = @transform_4, window_bounds = array<i64: 192, 192>}, {pipeline_mode = #tpu.pipeline_mode<synchronous>, transform_indices = @transform_5, window_bounds = array<i64: 1, 192>}, {pipeline_mode = #tpu.pipeline_mode<synchronous>, transform_indices = @transform_6, window_bounds = array<i64: 192, 48>}, {pipeline_mode = #tpu.pipeline_mode<synchronous>, transform_indices = @transform_7, window_bounds = array<i64: 1, 48>}, {pipeline_mode = #tpu.pipeline_mode<synchronous>, transform_indices = @transform_8, window_bounds = array<i64: 48, 48>}, {pipeline_mode = #tpu.pipeline_mode<synchronous>, transform_indices = @transform_9, window_bounds = array<i64: 1, 48>}, {pipeline_mode = #tpu.pipeline_mode<synchronous>, transform_indices = @transform_10, window_bounds = array<i64: 48, 48>}, {pipeline_mode = #tpu.pipeline_mode<synchronous>, transform_indices = @transform_11, window_bounds = array<i64: 1, 48>}, {pipeline_mode = #tpu.pipeline_mode<synchronous>, transform_indices = @transform_12, window_bounds = array<i64: 48, 48>}, {pipeline_mode = #tpu.pipeline_mode<synchronous>, transform_indices = @transform_13, window_bounds = array<i64: 1, 48>}, {transform_indices = @transform_14, window_bounds = array<i64: 64, 48>}]} {
    %c0 = arith.constant 0 : index
    %c0_0 = arith.constant 0 : index
    %0 = vector.load %arg1[%c0, %c0_0] : memref<64x192xbf16, #tpu.memory_space<vmem>>, vector<64x192xbf16>
    %c0_1 = arith.constant 0 : index
    %c0_2 = arith.constant 0 : index
    %1 = vector.load %arg3[%c0_1, %c0_2] : memref<192x192xbf16, #tpu.memory_space<vmem>>, vector<192x192xbf16>
    %cst = arith.constant dense<0.000000e+00> : vector<64x192xf32>
    %2 = tpu.matmul %0, %1, %cst {dimension_numbers = #tpu.dot_dimension_numbers<[1], [0], [0], [1], [0, 0, 1, 1], [], []>} : vector<64x192xbf16>, vector<192x192xbf16>, vector<64x192xf32> -> vector<64x192xf32>
    %c0_3 = arith.constant 0 : index
    %c0_4 = arith.constant 0 : index
    %3 = vector.load %arg4[%c0_3, %c0_4] : memref<1x192xf32, #tpu.memory_space<vmem>>, vector<1x192xf32>
    %4 = vector.broadcast %3 : vector<1x192xf32> to vector<64x192xf32>
    %5 = arith.addf %2, %4 : vector<64x192xf32>
    %cst_5 = arith.constant 0.000000e+00 : f32
    %6 = vector.broadcast %cst_5 : f32 to vector<64x192xf32>
    %7 = arith.maximumf %5, %6 : vector<64x192xf32>
    %8 = arith.truncf %7 : vector<64x192xf32> to vector<64x192xbf16>
    %c0_6 = arith.constant 0 : index
    %c0_7 = arith.constant 0 : index
    %9 = vector.load %arg5[%c0_6, %c0_7] : memref<192x192xbf16, #tpu.memory_space<vmem>>, vector<192x192xbf16>
    %cst_8 = arith.constant dense<0.000000e+00> : vector<64x192xf32>
    %10 = tpu.matmul %8, %9, %cst_8 {dimension_numbers = #tpu.dot_dimension_numbers<[1], [0], [0], [1], [0, 0, 1, 1], [], []>} : vector<64x192xbf16>, vector<192x192xbf16>, vector<64x192xf32> -> vector<64x192xf32>
    %c0_9 = arith.constant 0 : index
    %c0_10 = arith.constant 0 : index
    %11 = vector.load %arg6[%c0_9, %c0_10] : memref<1x192xf32, #tpu.memory_space<vmem>>, vector<1x192xf32>
    %12 = vector.broadcast %11 : vector<1x192xf32> to vector<64x192xf32>
    %13 = arith.addf %10, %12 : vector<64x192xf32>
    %cst_11 = arith.constant 0.000000e+00 : f32
    %14 = vector.broadcast %cst_11 : f32 to vector<64x192xf32>
    %15 = arith.maximumf %13, %14 : vector<64x192xf32>
    %16 = arith.truncf %15 : vector<64x192xf32> to vector<64x192xbf16>
    %c0_12 = arith.constant 0 : index
    %c0_13 = arith.constant 0 : index
    %17 = vector.load %arg7[%c0_12, %c0_13] : memref<192x48xbf16, #tpu.memory_space<vmem>>, vector<192x48xbf16>
    %cst_14 = arith.constant dense<0.000000e+00> : vector<64x48xf32>
    %18 = tpu.matmul %16, %17, %cst_14 {dimension_numbers = #tpu.dot_dimension_numbers<[1], [0], [0], [1], [0, 0, 1, 1], [], []>} : vector<64x192xbf16>, vector<192x48xbf16>, vector<64x48xf32> -> vector<64x48xf32>
    %c0_15 = arith.constant 0 : index
    %c0_16 = arith.constant 0 : index
    %19 = vector.load %arg8[%c0_15, %c0_16] : memref<1x48xf32, #tpu.memory_space<vmem>>, vector<1x48xf32>
    %20 = vector.broadcast %19 : vector<1x48xf32> to vector<64x48xf32>
    %21 = arith.addf %18, %20 : vector<64x48xf32>
    %22 = arith.truncf %21 : vector<64x48xf32> to vector<64x48xbf16>
    %c0_17 = arith.constant 0 : index
    %c0_18 = arith.constant 0 : index
    %23 = vector.load %arg9[%c0_17, %c0_18] : memref<48x48xbf16, #tpu.memory_space<vmem>>, vector<48x48xbf16>
    %cst_19 = arith.constant dense<0.000000e+00> : vector<64x48xf32>
    %24 = tpu.matmul %22, %23, %cst_19 {dimension_numbers = #tpu.dot_dimension_numbers<[1], [0], [0], [1], [0, 0, 1, 1], [], []>} : vector<64x48xbf16>, vector<48x48xbf16>, vector<64x48xf32> -> vector<64x48xf32>
    %c0_20 = arith.constant 0 : index
    %c0_21 = arith.constant 0 : index
    %25 = vector.load %arg10[%c0_20, %c0_21] : memref<1x48xf32, #tpu.memory_space<vmem>>, vector<1x48xf32>
    %26 = vector.broadcast %25 : vector<1x48xf32> to vector<64x48xf32>
    %27 = arith.addf %24, %26 : vector<64x48xf32>
    %cst_22 = arith.constant 0.000000e+00 : f32
    %28 = vector.broadcast %cst_22 : f32 to vector<64x48xf32>
    %29 = arith.maximumf %27, %28 : vector<64x48xf32>
    %30 = arith.truncf %29 : vector<64x48xf32> to vector<64x48xbf16>
    %c0_23 = arith.constant 0 : index
    %c0_24 = arith.constant 0 : index
    %31 = vector.load %arg11[%c0_23, %c0_24] : memref<48x48xbf16, #tpu.memory_space<vmem>>, vector<48x48xbf16>
    %cst_25 = arith.constant dense<0.000000e+00> : vector<64x48xf32>
    %32 = tpu.matmul %30, %31, %cst_25 {dimension_numbers = #tpu.dot_dimension_numbers<[1], [0], [0], [1], [0, 0, 1, 1], [], []>} : vector<64x48xbf16>, vector<48x48xbf16>, vector<64x48xf32> -> vector<64x48xf32>
    %c0_26 = arith.constant 0 : index
    %c0_27 = arith.constant 0 : index
    %33 = vector.load %arg12[%c0_26, %c0_27] : memref<1x48xf32, #tpu.memory_space<vmem>>, vector<1x48xf32>
    %34 = vector.broadcast %33 : vector<1x48xf32> to vector<64x48xf32>
    %35 = arith.addf %32, %34 : vector<64x48xf32>
    %cst_28 = arith.constant 0.000000e+00 : f32
    %36 = vector.broadcast %cst_28 : f32 to vector<64x48xf32>
    %37 = arith.maximumf %35, %36 : vector<64x48xf32>
    %38 = arith.truncf %37 : vector<64x48xf32> to vector<64x48xbf16>
    %c0_29 = arith.constant 0 : index
    %c0_30 = arith.constant 0 : index
    %39 = vector.load %arg13[%c0_29, %c0_30] : memref<48x48xbf16, #tpu.memory_space<vmem>>, vector<48x48xbf16>
    %cst_31 = arith.constant dense<0.000000e+00> : vector<64x48xf32>
    %40 = tpu.matmul %38, %39, %cst_31 {dimension_numbers = #tpu.dot_dimension_numbers<[1], [0], [0], [1], [0, 0, 1, 1], [], []>} : vector<64x48xbf16>, vector<48x48xbf16>, vector<64x48xf32> -> vector<64x48xf32>
    %c0_32 = arith.constant 0 : index
    %c0_33 = arith.constant 0 : index
    %41 = vector.load %arg14[%c0_32, %c0_33] : memref<1x48xf32, #tpu.memory_space<vmem>>, vector<1x48xf32>
    %42 = vector.broadcast %41 : vector<1x48xf32> to vector<64x48xf32>
    %43 = arith.addf %40, %42 : vector<64x48xf32>
    %c0_34 = arith.constant 0 : index
    %c0_35 = arith.constant 0 : index
    %44 = vector.load %arg2[%c0_34, %c0_35] : memref<64x1xf32, #tpu.memory_space<vmem>>, vector<64x1xf32>
    %45 = vector.broadcast %44 : vector<64x1xf32> to vector<64x48xf32>
    %46 = arith.mulf %43, %45 : vector<64x48xf32>
    %47 = arith.truncf %46 : vector<64x48xf32> to vector<64x48xbf16>
    %c0_36 = arith.constant 0 : index
    %c0_37 = arith.constant 0 : index
    %48 = vector.load %arg15[%c0_36, %c0_37] : memref<64x48xbf16, #tpu.memory_space<vmem>>, vector<64x48xbf16>
    tpu.vector_store %arg15[%c0_36, %c0_37], %47 {strides = array<i32>} : memref<64x48xbf16, #tpu.memory_space<vmem>>, vector<64x48xbf16>,
    return
  }
  func.func @transform_0(%arg0: i32) -> (i32, i32) {
    %c0_i32 = arith.constant 0 : i32
    %c0_i32_0 = arith.constant 0 : i32
    return %arg0, %c0_i32 : i32, i32
  }
  func.func @transform_1(%arg0: i32) -> (i32, i32) {
    %c0_i32 = arith.constant 0 : i32
    %c0_i32_0 = arith.constant 0 : i32
    return %arg0, %c0_i32 : i32, i32
  }
  func.func @transform_2(%arg0: i32) -> (i32, i32) {
    %c0_i32 = arith.constant 0 : i32
    %c0_i32_0 = arith.constant 0 : i32
    %c0_i32_1 = arith.constant 0 : i32
    return %c0_i32, %c0_i32_0 : i32, i32
  }
  func.func @transform_3(%arg0: i32) -> (i32, i32) {
    %c0_i32 = arith.constant 0 : i32
    %c0_i32_0 = arith.constant 0 : i32
    %c0_i32_1 = arith.constant 0 : i32
    return %c0_i32, %c0_i32_0 : i32, i32
  }
  func.func @transform_4(%arg0: i32) -> (i32, i32) {
    %c0_i32 = arith.constant 0 : i32
    %c0_i32_0 = arith.constant 0 : i32
    %c0_i32_1 = arith.constant 0 : i32
    return %c0_i32, %c0_i32_0 : i32, i32
  }
  func.func @transform_5(%arg0: i32) -> (i32, i32) {
    %c0_i32 = arith.constant 0 : i32
    %c0_i32_0 = arith.constant 0 : i32
    %c0_i32_1 = arith.constant 0 : i32
    return %c0_i32, %c0_i32_0 : i32, i32
  }
  func.func @transform_6(%arg0: i32) -> (i32, i32) {
    %c0_i32 = arith.constant 0 : i32
    %c0_i32_0 = arith.constant 0 : i32
    %c0_i32_1 = arith.constant 0 : i32
    return %c0_i32, %c0_i32_0 : i32, i32
  }
  func.func @transform_7(%arg0: i32) -> (i32, i32) {
    %c0_i32 = arith.constant 0 : i32
    %c0_i32_0 = arith.constant 0 : i32
    %c0_i32_1 = arith.constant 0 : i32
    return %c0_i32, %c0_i32_0 : i32, i32
  }
  func.func @transform_8(%arg0: i32) -> (i32, i32) {
    %c0_i32 = arith.constant 0 : i32
    %c0_i32_0 = arith.constant 0 : i32
    %c0_i32_1 = arith.constant 0 : i32
    return %c0_i32, %c0_i32_0 : i32, i32
  }
  func.func @transform_9(%arg0: i32) -> (i32, i32) {
    %c0_i32 = arith.constant 0 : i32
    %c0_i32_0 = arith.constant 0 : i32
    %c0_i32_1 = arith.constant 0 : i32
    return %c0_i32, %c0_i32_0 : i32, i32
  }
  func.func @transform_10(%arg0: i32) -> (i32, i32) {
    %c0_i32 = arith.constant 0 : i32
    %c0_i32_0 = arith.constant 0 : i32
    %c0_i32_1 = arith.constant 0 : i32
    return %c0_i32, %c0_i32_0 : i32, i32
  }
  func.func @transform_11(%arg0: i32) -> (i32, i32) {
    %c0_i32 = arith.constant 0 : i32
    %c0_i32_0 = arith.constant 0 : i32
    %c0_i32_1 = arith.constant 0 : i32
    return %c0_i32, %c0_i32_0 : i32, i32
  }
  func.func @transform_12(%arg0: i32) -> (i32, i32) {
    %c0_i32 = arith.constant 0 : i32
    %c0_i32_0 = arith.constant 0 : i32
    %c0_i32_1 = arith.constant 0 : i32
    return %c0_i32, %c0_i32_0 : i32, i32
  }
  func.func @transform_13(%arg0: i32) -> (i32, i32) {
    %c0_i32 = arith.constant 0 : i32
    %c0_i32_0 = arith.constant 0 : i32
    %c0_i32_1 = arith.constant 0 : i32
    return %c0_i32, %c0_i32_0 : i32, i32
  }
  func.func @transform_14(%arg0: i32) -> (i32, i32) {
    %c0_i32 = arith.constant 0 : i32
    %c0_i32_0 = arith.constant 0 : i32
    return %arg0, %c0_i32 : i32, i32
  }
}

</mosaic_0001>

<bundles_post_ra>
// kernel: tpu_custom_call.1
= control target key start
LH: loop header
LB: loop body
LE: loop exit
PB: predicated region body
PF: predicated region fallthrough
CT: control target
= control target key end

     0   :  { %s2169_s29 = smov 0   ;;  %s2500_s0 = inlined_call_operand.vmem [shape: bf16[512,192], index: 0, kind: input, shape index: {}]   ;;  %s2501_s1 = inlined_call_operand.vmem [shape: f32[512,1], index: 1, kind: input, shape index: {}]   ;;  %s2502_s2 = inlined_call_operand.vmem [shape: bf16[192,192], index: 2, kind: input, shape index: {}]   ;;  %s2503_s3 = inlined_call_operand.vmem [shape: f32[1,192], index: 3, kind: input, shape index: {}]   ;;  %s2504_s4 = inlined_call_operand.vmem [shape: bf16[192,192], index: 4, kind: input, shape index: {}]   ;;  %s2505_s5 = inlined_call_operand.vmem [shape: f32[1,192], index: 5, kind: input, shape index: {}]   ;;  %s2506_s6 = inlined_call_operand.vmem [shape: bf16[192,48], index: 6, kind: input, shape index: {}]   ;;  %s2507_s7 = inlined_call_operand.vmem [shape: f32[1,48], index: 7, kind: input, shape index: {}]   ;;  %s2508_s8 = inlined_call_operand.vmem [shape: bf16[48,48], index: 8, kind: input, shape index: {}]   ;;  %s2509_s9 = inlined_call_operand.vmem [shape: f32[1,48], index: 9, kind: input, shape index: {}]   ;;  %s2510_s10 = inlined_call_operand.vmem [shape: bf16[48,48], index: 10, kind: input, shape index: {}]   ;;  %s2511_s11 = inlined_call_operand.vmem [shape: f32[1,48], index: 11, kind: input, shape index: {}]   ;;  %s2512_s12 = inlined_call_operand.vmem [shape: bf16[48,48], index: 12, kind: input, shape index: {}]   ;;  %s2513_s13 = inlined_call_operand.vmem [shape: f32[1,48], index: 13, kind: input, shape index: {}]   ;;  %s2514_s14 = inlined_call_operand.vmem [shape: bf16[512,48], index: 14, kind: output, shape index: {}]  }
   0x1 LB: > { %s1770_s30 = sadd.s32 4294967295, %s2091_s29   ;;  %p1774_p0 = scmp.ge.s32.totalorder %s2091_s29, 1  ;;  %s2091_s29 = sphi %s2169_s29, %s24_s29  }
   0x2   : > { %p425_p1 = scmp.lt.s32.totalorder %s2091_s29, 9 }
   0x4   : > { %p426_p2 = pnand %p1774_p0, %p425_p1 }
   0x5   : > { %v1980_v0 = vld [vmem:[%s2502_s2 + $0x4] ss:$8 sps:$4 sm:$0xff] (!%p426_p2)   ;;  %s1775_s17 = sshll.u32 (!%p426_p2), %s1770_s30, 3  ;;  %v1982_v1 = vld [vmem:[%s2502_s2] ss:$8 sps:$4 sm:$0xff] (!%p426_p2)   ;;  %vm697_vm0 = vcmask (!%p426_p2), 523264  }
   0x6   : > { %429 = sbr.rel (%p426_p2) target bundleno = 1406 (0x57e), region = 76  ;;  %710 = vmatprep.subr.bf16.mxu0 (!%p426_p2), %v1980_v0  ;;  %v1983_v2 = vld [vmem:[%s2502_s2 + $0x14] ss:$8 sps:$4 sm:$0xff] (!%p426_p2)   ;;  %v1985_v3 = vld [vmem:[%s2502_s2 + $0x10] ss:$8 sps:$4 sm:$0xff] (!%p426_p2)   ;;  %p478_p3 = scmp.lt.s32.totalorder (!%p426_p2), %s1775_s17, 63 }
   0x7   : > { %711 = vmatpush1.bf16.msra.mxu0 (!%p426_p2), %v1982_v1  ;;  %v1986_v4 = vld [vmem:[%s2502_s2 + $0x24] ss:$8 sps:$4 sm:$0xff] (!%p426_p2)   ;;  %v1988_v5 = vld [vmem:[%s2502_s2 + $0x20] ss:$8 sps:$4 sm:$0xff] (!%p426_p2)   ;;  %v1989_v6 = vld [vmem:[%s2502_s2 + $0x34] ss:$8 sps:$4 sm:$0xff] (!%p426_p2)  }
   0x8   : > { %712 = vmatprep.subr.bf16.mxu0 (!%p426_p2), %v1983_v2  ;;  %v1991_v7 = vld [vmem:[%s2502_s2 + $0x30] ss:$8 sps:$4 sm:$0xff] (!%p426_p2)   ;;  %v1992_v8 = vld [vmem:[%s2502_s2 + $0x44] ss:$8 sps:$4 sm:$0xff] (!%p426_p2)   ;;  %v1994_v9 = vld [vmem:[%s2502_s2 + $0x40] ss:$8 sps:$4 sm:$0xff] (!%p426_p2)   ;;  %v531_v2 = vlaneseq (!%p426_p2) }
   0x9   : > { %v1995_v10 = vld [vmem:[%s2502_s2 + $0x54] ss:$8 sps:$4 sm:$0xff] (!%p426_p2)   ;;  %v1997_v12 = vld [vmem:[%s2502_s2 + $0x50] ss:$8 sps:$4 sm:$0xff] (!%p426_p2)   ;;  %v1998_v13 = vld [vmem:[%s2502_s2 + $0x64] ss:$8 sps:$4 sm:$0xff] (!%p426_p2)  }
   0xa   : > { %v2028_v14 = vld [vmem:[%s2504_s4 + $0x4] ss:$8 sps:$4 sm:$0xff] (!%p426_p2)   ;;  %v2030_v15 = vld [vmem:[%s2504_s4] ss:$8 sps:$4 sm:$0xff] (!%p426_p2)   ;;  %v2031_v17 = vld [vmem:[%s2504_s4 + $0x14] ss:$8 sps:$4 sm:$0xff] (!%p426_p2)  }
   0xb   : > { %713 = vmatpush1.bf16.msra.mxu0 (!%p426_p2), %v1985_v3  ;;  %v2000_v16 = vld [vmem:[%s2502_s2 + $0x60] ss:$8 sps:$4 sm:$0xff] (!%p426_p2)   ;;  %v2001_v18 = vld [vmem:[%s2502_s2 + $0x74] ss:$8 sps:$4 sm:$0xff] (!%p426_p2)   ;;  %975 = vmatprep.subr.bf16.mxu1 (!%p426_p2), %v2028_v14  ;;  %v2033_v19 = vld [vmem:[%s2504_s4 + $0x10] ss:$8 sps:$4 sm:$0xff] (!%p426_p2)  }
   0xc   : > { %714 = vmatprep.subr.bf16.mxu0 (!%p426_p2), %v1986_v4  ;;  %976 = vmatpush1.bf16.msra.mxu1 (!%p426_p2), %v2030_v15  ;;  %v2034_v20 = vld [vmem:[%s2504_s4 + $0x24] ss:$8 sps:$4 sm:$0xff] (!%p426_p2)   ;;  %v2003_v21 = vld [vmem:[%s2502_s2 + $0x70] ss:$8 sps:$4 sm:$0xff] (!%p426_p2)   ;;  %v2036_v23 = vld [vmem:[%s2504_s4 + $0x20] ss:$8 sps:$4 sm:$0xff] (!%p426_p2)  }
   0xd   : > { %s2516_s17 = smov (!%p478_p3, %s1775_s17), 63  ;;  %977 = vmatprep.subr.bf16.mxu1 %v2031_v17  ;;  %v2004_v22 = vld [vmem:[%s2502_s2 + $0x84] ss:$8 sps:$4 sm:$0xff]   ;;  %v2037_v24 = vld [vmem:[%s2504_s4 + $0x34] ss:$8 sps:$4 sm:$0xff]   ;;  %v2093_v57 = vmov 0  }
   0xe   : > { %s1897_s18 = sshll.u32 %s2516_s17, 3  ;;  %v2006_v25 = vld [vmem:[%s2502_s2 + $0x80] ss:$8 sps:$4 sm:$0xff]   ;;  %v2007_v26 = vld [vmem:[%s2502_s2 + $0x94] ss:$8 sps:$4 sm:$0xff]   ;;  %1979 = vset.pattern.permute.xlu1 %v2093_v57  ;;  %1978 = vset.pattern.permute.xlu0 %v2093_v57  ;;  %v2382_v3 = vshrl.u32 %v531_v2, 7 }
   0xf   : > { %715 = vmatpush1.bf16.msra.mxu0 %v1988_v5  ;;  %s2212_s23 = scalar_lea.vmem %s2500_s0, %s1897_s18  ;;  %v2009_v27 = vld [vmem:[%s2502_s2 + $0x90] ss:$8 sps:$4 sm:$0xff]   ;;  %v2010_v29 = vld [vmem:[%s2502_s2 + $0xa4] ss:$8 sps:$4 sm:$0xff]   ;;  %v2042_v31 = vld [vmem:[%s2504_s4 + $0x40] ss:$8 sps:$4 sm:$0xff]   ;;  %s488_s30 = scalar_lea.vmem %s2501_s1, %s1897_s18 }
  0x10   : > { %716 = vmatprep.subr.bf16.mxu0 %v1989_v6  ;;  %v2018_v11 = vld [vmem:[%s2212_s23 + $0x4] ss:$8 sps:$4 sm:$0xff]   ;;  %978 = vmatpush1.bf16.msra.mxu1 %v2033_v19  ;;  %v2039_v28 = vld [vmem:[%s2504_s4 + $0x30] ss:$8 sps:$4 sm:$0xff]   ;;  %v2043_v32 = vld [vmem:[%s2504_s4 + $0x54] ss:$8 sps:$4 sm:$0xff]  }
  0x11   : > { %1814 = vmatprep.mubr.msk.bf16.mxu0 %vm697_vm0, %v2018_v11  ;;  %979 = vmatprep.subr.bf16.mxu1 %v2034_v20  ;;  %v2040_v30 = vld [vmem:[%s2504_s4 + $0x44] ss:$8 sps:$4 sm:$0xff]   ;;  %v2012_v33 = vld [vmem:[%s2502_s2 + $0xa0] ss:$8 sps:$4 sm:$0xff]   ;;  %v2013_v34 = vld [vmem:[%s2502_s2 + $0xb4] ss:$8 sps:$4 sm:$0xff]  }
  0x12   : > { %v2045_v35 = vld [vmem:[%s2504_s4 + $0x50] ss:$8 sps:$4 sm:$0xff]   ;;  %v2046_v36 = vld [vmem:[%s2504_s4 + $0x64] ss:$8 sps:$4 sm:$0xff]   ;;  %v2048_v38 = vld [vmem:[%s2504_s4 + $0x60] ss:$8 sps:$4 sm:$0xff]  }
  0x13   : > { %717 = vmatpush1.bf16.msra.mxu0 %v1991_v7  ;;  %v2015_v37 = vld [vmem:[%s2502_s2 + $0xb0] ss:$8 sps:$4 sm:$0xff]   ;;  %v2016_v39 = vld [vmem:[%s2212_s23] ss:$8 sps:$4 sm:$0xff]   ;;  %v2049_v40 = vld [vmem:[%s2504_s4 + $0x74] ss:$8 sps:$4 sm:$0xff]  }
  0x14   : > { %718 = vmatprep.subr.bf16.mxu0 %v1992_v8  ;;  %980 = vmatpush1.bf16.msra.mxu1 %v2036_v23  ;;  %v2019_v41 = vld [vmem:[%s2212_s23 + $0x14] ss:$8 sps:$4 sm:$0xff]   ;;  %v2051_v42 = vld [vmem:[%s2504_s4 + $0x70] ss:$8 sps:$4 sm:$0xff]   ;;  %v2052_v43 = vld [vmem:[%s2504_s4 + $0x84] ss:$8 sps:$4 sm:$0xff]  }
  0x15   : > { %981 = vmatprep.subr.bf16.mxu1 %v2037_v24  ;;  %v2054_v44 = vld [vmem:[%s2504_s4 + $0x80] ss:$8 sps:$4 sm:$0xff]   ;;  %v2021_v45 = vld [vmem:[%s2212_s23 + $0x10] ss:$8 sps:$4 sm:$0xff]   ;;  %v2055_v46 = vld [vmem:[%s2504_s4 + $0x94] ss:$8 sps:$4 sm:$0xff]  }
  0x16   : > { %v2022_v47 = vld [vmem:[%s2212_s23 + $0x24] ss:$8 sps:$4 sm:$0xff]   ;;  %v2024_v48 = vld [vmem:[%s2212_s23 + $0x20] ss:$8 sps:$4 sm:$0xff]   ;;  %v2025_v49 = vld [vmem:[%s2212_s23 + $0x34] ss:$8 sps:$4 sm:$0xff]  }
  0x17   : > { %719 = vmatpush1.bf16.msra.mxu0 %v1994_v9  ;;  %v2027_v50 = vld [vmem:[%s2212_s23 + $0x30] ss:$8 sps:$4 sm:$0xff]   ;;  %v2058_v52 = vld [vmem:[%s2504_s4 + $0xa4] ss:$8 sps:$4 sm:$0xff]   ;;  %v2060_v53 = vld [vmem:[%s2504_s4 + $0xa0] ss:$8 sps:$4 sm:$0xff]  }
  0x18   : > { %720 = vmatprep.subr.bf16.mxu0 %v1995_v10  ;;  %982 = vmatpush1.bf16.msra.mxu1 %v2039_v28  ;;  %v2057_v51 = vld [vmem:[%s2504_s4 + $0x90] ss:$8 sps:$4 sm:$0xff]   ;;  %v2061_v54 = vld [vmem:[%s2504_s4 + $0xb4] ss:$8 sps:$4 sm:$0xff]   ;;  %v2064_v56 = vld [vmem:[%s2506_s6] sm:$0xff]   ;;  %v533_v4 = vsub.s32 0, %v2382_v3 }
  0x19   : > { %983 = vmatprep.subr.bf16.mxu1 %v2040_v30  ;;  %v2063_v55 = vld [vmem:[%s2504_s4 + $0xb0] ss:$8 sps:$4 sm:$0xff]   ;;  %v2065_v58 = vld [vmem:[%s2506_s6 + $0x8] sm:$0xff]   ;;  %v2068_v61 = vld [vmem:[%s2506_s6 + $0x20] sm:$0xff]   ;;  %v537_v6 = vsub.s32 1, %v2382_v3  ;;  %vm1287_vm1 = vcmask 392192  }
  0x1a   : > { %v2066_v59 = vld [vmem:[%s2506_s6 + $0x10] sm:$0xff]   ;;  %v2067_v60 = vld [vmem:[%s2506_s6 + $0x18] sm:$0xff]   ;;  %v2069_v62 = vld [vmem:[%s2506_s6 + $0x28] sm:$0xff]   ;;  %s1781_s20 = sshll.u32 %s2516_s17, 2  ;;  %vm1693_vm2 = vcmask 388096  }
  0x1b   : > { %721 = vmatpush1.bf16.msra.mxu0 %v1997_v12  ;;  %v2070_v63 = vld [vmem:[%s2506_s6 + $0x30] sm:$0xff]   ;;  %v2071_v0 = vld [vmem:[%s2506_s6 + $0x38] sm:$0xff]   ;;  %v2072_v1 = vld [vmem:[%s2506_s6 + $0x40] sm:$0xff]   ;;  %s2479_s24 = scalar_lea.vmem %s2514_s14, %s1781_s20 }
  0x1c   : > { %722 = vmatprep.subr.bf16.mxu0 %v1998_v13  ;;  %984 = vmatpush1.bf16.msra.mxu1 %v2042_v31  ;;  %v529_v5 = vld [vmem:[%s2503_s3] sm:$0x3]  ;;  %v2073_v2 = vld [vmem:[%s2506_s6 + $0x48] sm:$0xff]  }
  0x1d   : > { %985 = vmatprep.subr.bf16.mxu1 %v2043_v32  ;;  %v534_v7 = vrot.slane %v529_v5, %v533_v4  ;;  %v538_v8 = vrot.slane %v529_v5, %v537_v6  ;;  %v2074_v5 = vld [vmem:[%s2506_s6 + $0x50] sm:$0xff]  }
  0x1f   : > { %723 = vmatpush1.bf16.msra.mxu0 %v2000_v16 }
  0x20   : > { %724 = vmatprep.subr.bf16.mxu0 %v2001_v18  ;;  %986 = vmatpush1.bf16.msra.mxu1 %v2045_v35 }
  0x21   : > { %987 = vmatprep.subr.bf16.mxu1 %v2046_v36 }
  0x23   : > { %725 = vmatpush1.bf16.msra.mxu0 %v2003_v21 }
  0x24   : > { %726 = vmatprep.subr.bf16.mxu0 %v2004_v22  ;;  %988 = vmatpush1.bf16.msra.mxu1 %v2048_v38 }
  0x25   : > { %989 = vmatprep.subr.bf16.mxu1 %v2049_v40 }
  0x27   : > { %727 = vmatpush1.bf16.msra.mxu0 %v2006_v25 }
  0x28   : > { %728 = vmatprep.subr.bf16.mxu0 %v2007_v26  ;;  %990 = vmatpush1.bf16.msra.mxu1 %v2051_v42 }
  0x29   : > { %991 = vmatprep.subr.bf16.mxu1 %v2052_v43 }
  0x2b   : > { %729 = vmatpush1.bf16.msra.mxu0 %v2009_v27 }
  0x2c   : > { %730 = vmatprep.subr.bf16.mxu0 %v2010_v29  ;;  %992 = vmatpush1.bf16.msra.mxu1 %v2054_v44 }
  0x2d   : > { %993 = vmatprep.subr.bf16.mxu1 %v2055_v46 }
  0x2f   : > { %731 = vmatpush1.bf16.msra.mxu0 %v2012_v33 }
  0x30   : > { %732 = vmatprep.subr.bf16.mxu0 %v2013_v34  ;;  %994 = vmatpush1.bf16.msra.mxu1 %v2057_v51 }
  0x31   : > { %995 = vmatprep.subr.bf16.mxu1 %v2058_v52 }
  0x33   : > { %733 = vmatpush1.bf16.msra.mxu0 %v2015_v37 }
  0x34   : > { %996 = vmatpush1.bf16.msra.mxu1 %v2060_v53  ;;  %1187 = vmatprep.subr.bf16.mxu0 %v2093_v57 }
  0x35   : > { %997 = vmatprep.subr.bf16.mxu1 %v2061_v54 }
  0x36   : > { %743 = vmatmul.mubr.bf16.vlgmr.msra.gmra.mrb[0].mxu0 %v2016_v39 }
  0x37   : > { %1815 = vmatprep.mubr.msk.bf16.mxu0 %vm697_vm0, %v2019_v41  ;;  %1188 = vmatpush1.bf16.msra.mxu0 %v2064_v56 }
  0x38   : > { %998 = vmatpush1.bf16.msra.mxu1 %v2063_v55  ;;  %1189 = vmatprep.subr.bf16.mxu0 %v2093_v57 }
  0x3b   : > { %1190 = vmatpush1.bf16.msra.mxu0 %v2065_v58 }
  0x3c   : > { %1191 = vmatprep.subr.bf16.mxu0 %v2093_v57 }
  0x3e   : > { %753 = vmatmul.mubr.bf16.gmra.mrb[4].mxu0 %v2021_v45 }
  0x3f   : > { %1816 = vmatprep.mubr.msk.bf16.mxu0 %vm697_vm0, %v2022_v47  ;;  %1192 = vmatpush1.bf16.msra.mxu0 %v2066_v59 }
  0x40   : > { %1193 = vmatprep.subr.bf16.mxu0 %v2093_v57 }
  0x43   : > { %1194 = vmatpush1.bf16.msra.mxu0 %v2067_v60 }
  0x44   : > { %1195 = vmatprep.subr.bf16.mxu0 %v2093_v57 }
  0x46   : > { %763 = vmatmul.mubr.bf16.gmra.mrb[8].mxu0 %v2024_v48 }
  0x47   : > { %1817 = vmatprep.mubr.msk.bf16.mxu0 %vm697_vm0, %v2025_v49  ;;  %1196 = vmatpush1.bf16.msra.mxu0 %v2068_v61 }
  0x48   : > { %1197 = vmatprep.subr.bf16.mxu0 %v2093_v57 }
  0x4b   : > { %1198 = vmatpush1.bf16.msra.mxu0 %v2069_v62 }
  0x4c   : > { %1199 = vmatprep.subr.bf16.mxu0 %v2093_v57 }
  0x4e   : > { %773 = vmatmul.mubr.bf16.gmra.mrb[12].mxu0 %v2027_v50 }
  0x4f   : > { %1200 = vmatpush1.bf16.msra.mxu0 %v2070_v63 }
  0x50   : > { %1201 = vmatprep.subr.bf16.mxu0 %v2093_v57 }
  0x53   : > { %1202 = vmatpush1.bf16.msra.mxu0 %v2071_v0 }
  0x54   : > { %1203 = vmatprep.subr.bf16.mxu0 %v2093_v57 }
  0x57   : > { %1204 = vmatpush1.bf16.msra.mxu0 %v2072_v1 }
  0x58   : > { %1205 = vmatprep.subr.bf16.mxu0 %v2093_v57 }
  0x5b   : > { %1206 = vmatpush1.bf16.msra.mxu0 %v2073_v2  ;;  %v2078_v2 = vld [vmem:[%s2508_s8 + $0x10] sm:$0xff]  }
  0x5c   : > { %1207 = vmatprep.subr.bf16.mxu0 %v2093_v57 }
  0x5f   : > { %1208 = vmatpush1.bf16.msra.mxu0 %v2074_v5  ;;  %v2079_v5 = vld [vmem:[%s2510_s10] sm:$0xff]  }
  0x60   : > { %1209 = vmatprep.subr.bf16.mxu0 %v2093_v57 }
 0x109   : > { %v744_v9 = vpop.f32.mrb[0].mxu0 }
 0x10a   : > { %v745_v10 = vadd.f32 %v744_v9, %v534_v7  ;;  %v746_v11 = vpop.f32.mrb[1].mxu0  ;;  %v831_v9 = vld [vmem:[%s2505_s5] sm:$0x3] }
 0x10b   : > { %v747_v12 = vadd.f32 %v746_v11, %v538_v8  ;;  %v748_v13 = vpop.f32.mrb[2].mxu0  ;;  %v840_v57 = vrot.slane %v831_v9, %v537_v6 }
 0x10c   : > { %v749_v14 = vadd.f32 %v748_v13, %v534_v7  ;;  %v750_v15 = vpop.f32.mrb[3].mxu0  ;;  %v783_v17 = vmax.f32 %v745_v10, 0.0  ;;  %v836_v10 = vrot.slane %v831_v9, %v533_v4 }
 0x10d   : > { %v751_v16 = vadd.f32 %v750_v15, %v538_v8  ;;  %v784_v19 = vmax.f32 %v747_v12, 0.0 }
 0x10e   : > { %v785_v18 = vmax.f32 %v749_v14, 0.0 }
 0x10f   : > { %v786_v20 = vmax.f32 %v751_v16, 0.0 }
 0x110   : > { %v799_v21 = vpack.c.bf16 %v785_v18, %v783_v17 }
 0x111   : > { %v754_v22 = vpop.f32.mrb[4].mxu0  ;;  %v800_v23 = vpack.c.bf16 %v786_v20, %v784_v19 }
 0x112   : > { %v755_v24 = vadd.f32 %v754_v22, %v534_v7  ;;  %v756_v25 = vpop.f32.mrb[5].mxu0 }
 0x113   : > { %v757_v26 = vadd.f32 %v756_v25, %v538_v8  ;;  %v758_v27 = vpop.f32.mrb[6].mxu0  ;;  %1842 = vmatprep.mubr.msk.bf16.mxu1 %vm697_vm0, %v800_v23 }
 0x114   : > { %v759_v28 = vadd.f32 %v758_v27, %v534_v7  ;;  %v760_v29 = vpop.f32.mrb[7].mxu0  ;;  %1008 = vmatmul.mubr.bf16.vlgmr.msra.gmra.mrb[0].mxu1 %v799_v21  ;;  %v787_v31 = vmax.f32 %v755_v24, 0.0 }
 0x115   : > { %v761_v30 = vadd.f32 %v760_v29, %v538_v8  ;;  %v788_v33 = vmax.f32 %v757_v26, 0.0 }
 0x116   : > { %v789_v32 = vmax.f32 %v759_v28, 0.0 }
 0x117   : > { %v790_v34 = vmax.f32 %v761_v30, 0.0 }
 0x118   : > { %v801_v35 = vpack.c.bf16 %v789_v32, %v787_v31 }
 0x119   : > { %v802_v36 = vpack.c.bf16 %v790_v34, %v788_v33  ;;  %v764_v37 = vpop.f32.mrb[8].mxu0 }
 0x11a   : > { %v765_v38 = vadd.f32 %v764_v37, %v534_v7  ;;  %v766_v39 = vpop.f32.mrb[9].mxu0 }
 0x11b   : > { %v767_v40 = vadd.f32 %v766_v39, %v538_v8  ;;  %v768_v41 = vpop.f32.mrb[10].mxu0  ;;  %1843 = vmatprep.mubr.msk.bf16.mxu1 %vm697_vm0, %v802_v36 }
 0x11c   : > { %v769_v42 = vadd.f32 %v768_v41, %v534_v7  ;;  %v770_v43 = vpop.f32.mrb[11].mxu0  ;;  %1018 = vmatmul.mubr.bf16.gmra.mrb[4].mxu1 %v801_v35  ;;  %v791_v45 = vmax.f32 %v765_v38, 0.0 }
 0x11d   : > { %v771_v44 = vadd.f32 %v770_v43, %v538_v8  ;;  %v792_v47 = vmax.f32 %v767_v40, 0.0 }
 0x11e   : > { %v793_v46 = vmax.f32 %v769_v42, 0.0 }
 0x11f   : > { %v794_v48 = vmax.f32 %v771_v44, 0.0 }
 0x120   : > { %v803_v49 = vpack.c.bf16 %v793_v46, %v791_v45 }
 0x121   : > { %v804_v50 = vpack.c.bf16 %v794_v48, %v792_v47  ;;  %v774_v51 = vpop.f32.mrb[12].mxu0 }
 0x122   : > { %v775_v52 = vadd.f32 %v774_v51, %v534_v7  ;;  %v776_v53 = vpop.f32.mrb[13].mxu0 }
 0x123   : > { %v777_v54 = vadd.f32 %v776_v53, %v538_v8  ;;  %v778_v55 = vpop.f32.mrb[14].mxu0  ;;  %1844 = vmatprep.mubr.msk.bf16.mxu1 %vm697_vm0, %v804_v50 }
 0x124   : > { %v779_v56 = vadd.f32 %v778_v55, %v534_v7  ;;  %v780_v58 = vpop.f32.mrb[15].mxu0  ;;  %1028 = vmatmul.mubr.bf16.gmra.mrb[8].mxu1 %v803_v49  ;;  %v795_v60 = vmax.f32 %v775_v52, 0.0  ;;  %v2075_v7 = vld [vmem:[%s2506_s6 + $0x58] sm:$0xff]  }
 0x125   : > { %v781_v59 = vadd.f32 %v780_v58, %v538_v8  ;;  %v796_v62 = vmax.f32 %v777_v54, 0.0  ;;  %1210 = vmatpush1.bf16.msra.mxu0 %v2075_v7  ;;  %v2076_v8 = vld [vmem:[%s2508_s8] sm:$0xff]  }
 0x126   : > { %v797_v61 = vmax.f32 %v779_v56, 0.0  ;;  %1927 = vmatprep.subr.bf16.mxu1 %v2076_v8  ;;  %v1846_v7 = vld [vmem:[%s2507_s7] ss:$0 sm:$0xff] }
 0x127   : > { %v798_v63 = vmax.f32 %v781_v59, 0.0  ;;  %1928 = vmatpush3.bf16.msra.mxu1 %v2076_v8 }
 0x128   : > { %v805_v0 = vpack.c.bf16 %v797_v61, %v795_v60 }
 0x129   : > { %v806_v1 = vpack.c.bf16 %v798_v63, %v796_v62 }
 0x12b   : > { %1845 = vmatprep.mubr.msk.bf16.mxu1 %vm697_vm0, %v806_v1  ;;  %v2077_v1 = vld [vmem:[%s2508_s8 + $0x8] sm:$0xff]  }
 0x12c   : > { %1038 = vmatmul.mubr.bf16.gmra.mrb[12].mxu1 %v805_v0  ;;  %1929 = vmatprep.subr.bf16.mxu1 %v2077_v1 }
 0x12d   : > { %1930 = vmatpush3.bf16.msra.mxu1 %v2077_v1  ;;  %v2083_v1 = vld [vmem:[%s2512_s12 + $0x8] sm:$0xff]  }
 0x12e   : > { %1931 = vmatprep.subr.bf16.mxu1 %v2078_v2 }
 0x131   : > { %1932 = vmatpush3.bf16.msra.mxu1 %v2078_v2  ;;  %v2084_v2 = vld [vmem:[%s2512_s12 + $0x10] sm:$0xff]  }
 0x132   : > { %1941 = vmatprep.subr.bf16.mxu1 %v2079_v5 }
 0x1e7   : > { %v1009_v11 = vpop.f32.mrb[0].mxu1 }
 0x1e8   : > { %v1010_v12 = vadd.f32 %v1009_v11, %v836_v10  ;;  %v1011_v13 = vpop.f32.mrb[1].mxu1 }
 0x1e9   : > { %v1012_v14 = vadd.f32 %v1011_v13, %v840_v57  ;;  %v1013_v15 = vpop.f32.mrb[2].mxu1 }
 0x1ea   : > { %v1014_v16 = vadd.f32 %v1013_v15, %v836_v10  ;;  %v1015_v17 = vpop.f32.mrb[3].mxu1  ;;  %v1048_v19 = vmax.f32 %v1010_v12, 0.0 }
 0x1eb   : > { %v1016_v18 = vadd.f32 %v1015_v17, %v840_v57  ;;  %v1049_v21 = vmax.f32 %v1012_v14, 0.0 }
 0x1ec   : > { %v1050_v20 = vmax.f32 %v1014_v16, 0.0 }
 0x1ed   : > { %v1051_v22 = vmax.f32 %v1016_v18, 0.0 }
 0x1ee   : > { %v1064_v23 = vpack.c.bf16 %v1050_v20, %v1048_v19 }
 0x1ef   : > { %v1065_v24 = vpack.c.bf16 %v1051_v22, %v1049_v21  ;;  %v1019_v25 = vpop.f32.mrb[4].mxu1 }
 0x1f0   : > { %v1020_v26 = vadd.f32 %v1019_v25, %v836_v10  ;;  %v1021_v4 = vpop.f32.mrb[5].mxu1 }
 0x1f1   : > { %v1022_v27 = vadd.f32 %v1021_v4, %v840_v57  ;;  %v1023_v3 = vpop.f32.mrb[6].mxu1  ;;  %1859 = vmatprep.mubr.msk.bf16.mxu0 %vm697_vm0, %v1065_v24 }
 0x1f2   : > { %v1024_v6 = vadd.f32 %v1023_v3, %v836_v10  ;;  %v1025_v28 = vpop.f32.mrb[7].mxu1  ;;  %1220 = vmatmul.mubr.bf16.vlgmr.msra.gmra.mrb[16].mxu0 %v1064_v23  ;;  %v1052_v30 = vmax.f32 %v1020_v26, 0.0 }
 0x1f3   : > { %v1026_v29 = vadd.f32 %v1025_v28, %v840_v57  ;;  %v1053_v32 = vmax.f32 %v1022_v27, 0.0 }
 0x1f4   : > { %v1054_v31 = vmax.f32 %v1024_v6, 0.0 }
 0x1f5   : > { %v1055_v33 = vmax.f32 %v1026_v29, 0.0 }
 0x1f6   : > { %v1066_v34 = vpack.c.bf16 %v1054_v31, %v1052_v30 }
 0x1f7   : > { %v1067_v35 = vpack.c.bf16 %v1055_v33, %v1053_v32  ;;  %v1029_v36 = vpop.f32.mrb[8].mxu1  ;;  %v2080_v32 = vld [vmem:[%s2510_s10 + $0x8] sm:$0xff]   ;;  %v2081_v33 = vld [vmem:[%s2510_s10 + $0x10] sm:$0xff]  }
 0x1f8   : > { %v1030_v37 = vadd.f32 %v1029_v36, %v836_v10  ;;  %v1031_v38 = vpop.f32.mrb[9].mxu1 }
 0x1f9   : > { %v1032_v39 = vadd.f32 %v1031_v38, %v840_v57  ;;  %v1033_v40 = vpop.f32.mrb[10].mxu1  ;;  %1860 = vmatprep.mubr.msk.bf16.mxu0 %vm697_vm0, %v1067_v35  ;;  %v1863_v35 = vld [vmem:[%s2509_s9] ss:$0 sm:$0xff] }
 0x1fa   : > { %v1034_v41 = vadd.f32 %v1033_v40, %v836_v10  ;;  %v1035_v42 = vpop.f32.mrb[11].mxu1  ;;  %1228 = vmatmul.mubr.bf16.gmra.mrb[20].mxu0 %v1066_v34  ;;  %v1056_v44 = vmax.f32 %v1030_v37, 0.0  ;;  %v2082_v34 = vld [vmem:[%s2512_s12] sm:$0xff]  }
 0x1fb   : > { %v1036_v43 = vadd.f32 %v1035_v42, %v840_v57  ;;  %v1057_v46 = vmax.f32 %v1032_v39, 0.0 }
 0x1fc   : > { %v1058_v45 = vmax.f32 %v1034_v41, 0.0 }
 0x1fd   : > { %v1059_v47 = vmax.f32 %v1036_v43, 0.0 }
 0x1fe   : > { %v1068_v48 = vpack.c.bf16 %v1058_v45, %v1056_v44 }
 0x1ff   : > { %v1069_v49 = vpack.c.bf16 %v1059_v47, %v1057_v46  ;;  %v1039_v50 = vpop.f32.mrb[12].mxu1 }
 0x200   : > { %v1040_v51 = vadd.f32 %v1039_v50, %v836_v10  ;;  %v1041_v52 = vpop.f32.mrb[13].mxu1 }
 0x201   : > { %v1042_v53 = vadd.f32 %v1041_v52, %v840_v57  ;;  %v1043_v54 = vpop.f32.mrb[14].mxu1  ;;  %1861 = vmatprep.mubr.msk.bf16.mxu0 %vm697_vm0, %v1069_v49 }
 0x202   : > { %v1044_v55 = vadd.f32 %v1043_v54, %v836_v10  ;;  %v1045_v56 = vpop.f32.mrb[15].mxu1  ;;  %1236 = vmatmul.mubr.bf16.gmra.mrb[24].mxu0 %v1068_v48  ;;  %v1060_v59 = vmax.f32 %v1040_v51, 0.0 }
 0x203   : > { %v1046_v58 = vadd.f32 %v1045_v56, %v840_v57  ;;  %v1061_v61 = vmax.f32 %v1042_v53, 0.0 }
 0x204   : > { %v1062_v60 = vmax.f32 %v1044_v55, 0.0 }
 0x205   : > { %v1063_v62 = vmax.f32 %v1046_v58, 0.0 }
 0x206   : > { %v1070_v63 = vpack.c.bf16 %v1062_v60, %v1060_v59 }
 0x207   : > { %v1071_v0 = vpack.c.bf16 %v1063_v62, %v1061_v61 }
 0x209   : > { %1862 = vmatprep.mubr.msk.bf16.mxu0 %vm697_vm0, %v1071_v0 }
 0x20a   : > { %1244 = vmatmul.mubr.bf16.gmra.mrb[28].mxu0 %v1070_v63 }
 0x2c5   : > { %v1221_v8 = vpop.f32.mrb[16].mxu0 }
 0x2c6   : > { %v1223_v9 = vpop.f32.mrb[17].mxu0  ;;  %v1222_v57 = vadd.f32 %v1846_v7, %v1221_v8  ;;  %v1608_v8 = vld [vmem:[%s488_s30 + $0x18] sm:$0xff] }
 0x2c7   : > { %v1224_v10 = vpop.f32.mrb[18].mxu0  ;;  %v1606_v9 = vld [vmem:[%s488_s30 + $0x8] sm:$0xff] }
 0x2c8   : > { %v1225_v11 = vadd.f32 %v1846_v7, %v1224_v10  ;;  %v1226_v12 = vpop.f32.mrb[19].mxu0  ;;  %v1610_v10 = vld [vmem:[%s488_s30 + $0x28] sm:$0xff] }
 0x2c9   : > { %v1611_v12 = vld [vmem:[%s488_s30 + $0x30] sm:$0xff] }
 0x2ca   : > { %v1252_v13 = vpack.c.bf16 %v1225_v11, %v1222_v57  ;;  %v1609_v57 = vld [vmem:[%s488_s30 + $0x20] sm:$0xff]  ;;  %v1612_v11 = vld [vmem:[%s488_s30 + $0x38] sm:$0xff] }
 0x2cc   : > { %1933 = vmatprep.mubr.msk.bf16.mxu1 %vm1287_vm1, %v1252_v13  ;;  %v1871_v13 = vld [vmem:[%s2511_s11] ss:$0 sm:$0xff] }
 0x2cd   : > { %v1229_v14 = vpop.f32.mrb[20].mxu0 }
 0x2ce   : > { %v1231_v15 = vpop.f32.mrb[21].mxu0  ;;  %v1230_v17 = vadd.f32 %v1846_v7, %v1229_v14 }
 0x2cf   : > { %v1232_v16 = vpop.f32.mrb[22].mxu0 }
 0x2d0   : > { %v1233_v18 = vadd.f32 %v1846_v7, %v1232_v16  ;;  %v1234_v19 = vpop.f32.mrb[23].mxu0 }
 0x2d2   : > { %v1253_v20 = vpack.c.bf16 %v1233_v18, %v1230_v17 }
 0x2d4   : > { %1934 = vmatmul.mubr.msk.bf16.vlgmr.msra.gmra.mrb[16].mxu1 %vm1287_vm1, %v1253_v20 }
 0x2d5   : > { %v1237_v21 = vpop.f32.mrb[24].mxu0  ;;  %1942 = vmatpush3.bf16.msra.mxu1 %v2079_v5  ;;  %v1607_v5 = vld [vmem:[%s488_s30 + $0x10] sm:$0xff] }
 0x2d6   : > { %v1239_v22 = vpop.f32.mrb[25].mxu0  ;;  %v1238_v24 = vadd.f32 %v1846_v7, %v1237_v21  ;;  %1943 = vmatprep.subr.bf16.mxu1 %v2080_v32  ;;  %1625 = vperm.xlu1 %1979, %v1607_v5  }
 0x2d7   : > { %v1240_v23 = vpop.f32.mrb[26].mxu0 }
 0x2d8   : > { %v1241_v25 = vadd.f32 %v1846_v7, %v1240_v23  ;;  %v1242_v26 = vpop.f32.mrb[27].mxu0 }
 0x2d9   : > { %1944 = vmatpush3.bf16.msra.mxu1 %v2080_v32 }
 0x2da   : > { %v1254_v4 = vpack.c.bf16 %v1241_v25, %v1238_v24  ;;  %1945 = vmatprep.subr.bf16.mxu1 %v2081_v33  ;;  %1630 = vperm.xlu1 %1979, %v1608_v8  }
 0x2dc   : > { %1937 = vmatprep.mubr.msk.bf16.mxu1 %vm1287_vm1, %v1254_v4 }
 0x2dd   : > { %v1245_v27 = vpop.f32.mrb[28].mxu0  ;;  %1946 = vmatpush3.bf16.msra.mxu1 %v2081_v33 }
 0x2de   : > { %v1247_v3 = vpop.f32.mrb[29].mxu0  ;;  %v1246_v28 = vadd.f32 %v1846_v7, %v1245_v27  ;;  %1955 = vmatprep.subr.bf16.mxu1 %v2082_v34  ;;  %1640 = vperm.xlu1 %1979, %v1610_v10  }
 0x2df   : > { %v1248_v6 = vpop.f32.mrb[30].mxu0 }
 0x2e0   : > { %v1249_v29 = vadd.f32 %v1846_v7, %v1248_v6  ;;  %v1250_v30 = vpop.f32.mrb[31].mxu0  ;;  %v1605_v7 = vld [vmem:[%s488_s30] sm:$0xff] }
 0x2e1   : > { %1615 = vperm.xlu0 %1978, %v1605_v7  }
 0x2e2   : > { %v1255_v31 = vpack.c.bf16 %v1249_v29, %v1246_v28  ;;  %1650 = vperm.xlu1 %1979, %v1612_v11  }
 0x2e4   : > { %1938 = vmatmul.mubr.msk.bf16.gmra.mrb[20].mxu1 %vm1287_vm1, %v1255_v31 }
 0x2e5   : > { %1620 = vperm.xlu0 %1978, %v1606_v9  }
 0x2e9   : > { %1635 = vperm.xlu0 %1978, %v1609_v57  }
 0x2ed   : > { %1645 = vperm.xlu0 %1978, %v1611_v12  }
 0x3a7   : > { %v1935_v36 = vpop.f32.mrb[16].mxu1 }
 0x3a8   : > { %v1343_v37 = vadd.f32 %v1935_v36, %v1863_v35  ;;  %v1334_v38 = vpop.f32.mrb[17].mxu1 }
 0x3a9   : > { %v1335_v39 = vadd.f32 %v1863_v35, %v1334_v38  ;;  %v1936_v40 = vpop.f32.mrb[18].mxu1 }
 0x3aa   : > { %v1346_v41 = vadd.f32 %v1936_v40, %v1863_v35  ;;  %v1337_v42 = vpop.f32.mrb[19].mxu1  ;;  %v1367_v44 = vmax.f32 %v1343_v37, 0.0  ;;  %v1879_v40 = vld [vmem:[%s2513_s13] ss:$0 sm:$0xff] }
 0x3ab   : > { %v1338_v43 = vadd.f32 %v1863_v35, %v1337_v42  ;;  %v1365_v46 = vmax.f32 %v1335_v39, 0.0  ;;  %v1626_v39 = vpop.permute.xlu1 %1625 }
 0x3ac   : > { %v1368_v45 = vmax.f32 %v1346_v41, 0.0  ;;  %v1616_v41 = vpop.permute.xlu0 %1615 }
 0x3ad   : > { %v1366_v47 = vmax.f32 %v1338_v43, 0.0 }
 0x3ae   : > { %v1374_v48 = vpack.c.bf16 %v1368_v45, %v1367_v44 }
 0x3af   : > { %v1373_v49 = vpack.c.bf16 %v1366_v47, %v1365_v46 }
 0x3b1   : > { %1947 = vmatprep.mubr.msk.bf16.mxu1 %vm1287_vm1, %v1373_v49 }
 0x3b2   : > { %1948 = vmatmul.mubr.msk.bf16.vlgmr.msra.gmra.mrb[24].mxu1 %vm1287_vm1, %v1374_v48 }
 0x3b3   : > { %1956 = vmatpush3.bf16.msra.mxu1 %v2082_v34 }
 0x3b4   : > { %1957 = vmatprep.subr.bf16.mxu1 %v2083_v1 }
 0x3b7   : > { %v1939_v50 = vpop.f32.mrb[20].mxu1  ;;  %1958 = vmatpush3.bf16.msra.mxu1 %v2083_v1 }
 0x3b8   : > { %v1359_v51 = vadd.f32 %v1939_v50, %v1863_v35  ;;  %v1350_v52 = vpop.f32.mrb[21].mxu1  ;;  %1959 = vmatprep.subr.bf16.mxu1 %v2084_v2  ;;  %v1631_v50 = vpop.permute.xlu1 %1630 }
 0x3b9   : > { %v1351_v53 = vadd.f32 %v1863_v35, %v1350_v52  ;;  %v1940_v54 = vpop.f32.mrb[22].mxu1 }
 0x3ba   : > { %v1362_v55 = vadd.f32 %v1940_v54, %v1863_v35  ;;  %v1353_v56 = vpop.f32.mrb[23].mxu1  ;;  %v1371_v59 = vmax.f32 %v1359_v51, 0.0  ;;  %v1621_v54 = vpop.permute.xlu0 %1620 }
 0x3bb   : > { %v1354_v58 = vadd.f32 %v1863_v35, %v1353_v56  ;;  %v1369_v61 = vmax.f32 %v1351_v53, 0.0  ;;  %1960 = vmatpush3.bf16.msra.mxu1 %v2084_v2 }
 0x3bc   : > { %v1372_v60 = vmax.f32 %v1362_v55, 0.0 }
 0x3bd   : > { %v1370_v62 = vmax.f32 %v1354_v58, 0.0 }
 0x3be   : > { %v1376_v63 = vpack.c.bf16 %v1372_v60, %v1371_v59 }
 0x3bf   : > { %v1375_v0 = vpack.c.bf16 %v1370_v62, %v1369_v61  ;;  %v1636_v61 = vpop.permute.xlu0 %1635  ;;  %v1641_v62 = vpop.permute.xlu1 %1640 }
 0x3c1   : > { %1951 = vmatprep.mubr.msk.bf16.mxu1 %vm1287_vm1, %v1375_v0 }
 0x3c2   : > { %1952 = vmatmul.mubr.msk.bf16.gmra.mrb[28].mxu1 %vm1287_vm1, %v1376_v63 }
 0x3c3   : > { %v1646_v2 = vpop.permute.xlu0 %1645  ;;  %v1651_v57 = vpop.permute.xlu1 %1650 }
 0x485   : > { %v1949_v14 = vpop.f32.mrb[24].mxu1 }
 0x486   : > { %v1463_v15 = vadd.f32 %v1949_v14, %v1871_v13  ;;  %v1454_v16 = vpop.f32.mrb[25].mxu1 }
 0x487   : > { %v1455_v17 = vadd.f32 %v1871_v13, %v1454_v16  ;;  %v1950_v18 = vpop.f32.mrb[26].mxu1 }
 0x488   : > { %v1466_v19 = vadd.f32 %v1950_v18, %v1871_v13  ;;  %v1457_v20 = vpop.f32.mrb[27].mxu1  ;;  %v1487_v22 = vmax.f32 %v1463_v15, 0.0 }
 0x489   : > { %v1458_v21 = vadd.f32 %v1871_v13, %v1457_v20  ;;  %v1485_v24 = vmax.f32 %v1455_v17, 0.0 }
 0x48a   : > { %v1488_v23 = vmax.f32 %v1466_v19, 0.0 }
 0x48b   : > { %v1486_v25 = vmax.f32 %v1458_v21, 0.0 }
 0x48c   : > { %v1494_v26 = vpack.c.bf16 %v1488_v23, %v1487_v22 }
 0x48d   : > { %v1493_v4 = vpack.c.bf16 %v1486_v25, %v1485_v24 }
 0x48f   : > { %1961 = vmatprep.mubr.msk.bf16.mxu1 %vm1287_vm1, %v1493_v4 }
 0x490   : > { %1962 = vmatmul.mubr.msk.bf16.vlgmr.msra.gmra.mrb[32].mxu1 %vm1287_vm1, %v1494_v26 }
 0x495   : > { %v1953_v27 = vpop.f32.mrb[28].mxu1 }
 0x496   : > { %v1479_v3 = vadd.f32 %v1953_v27, %v1871_v13  ;;  %v1470_v6 = vpop.f32.mrb[29].mxu1 }
 0x497   : > { %v1471_v28 = vadd.f32 %v1871_v13, %v1470_v6  ;;  %v1954_v29 = vpop.f32.mrb[30].mxu1 }
 0x498   : > { %v1482_v30 = vadd.f32 %v1954_v29, %v1871_v13  ;;  %v1473_v31 = vpop.f32.mrb[31].mxu1  ;;  %v1491_v33 = vmax.f32 %v1479_v3, 0.0 }
 0x499   : > { %v1474_v32 = vadd.f32 %v1871_v13, %v1473_v31  ;;  %v1489_v35 = vmax.f32 %v1471_v28, 0.0 }
 0x49a   : > { %v1492_v34 = vmax.f32 %v1482_v30, 0.0 }
 0x49b   : > { %v1490_v36 = vmax.f32 %v1474_v32, 0.0 }
 0x49c   : > { %v1496_v37 = vpack.c.bf16 %v1492_v34, %v1491_v33 }
 0x49d   : > { %v1495_v38 = vpack.c.bf16 %v1490_v36, %v1489_v35 }
 0x49f   : > { %1965 = vmatprep.mubr.msk.bf16.mxu1 %vm1287_vm1, %v1495_v38 }
 0x4a0   : > { %1966 = vmatmul.mubr.msk.bf16.gmra.mrb[36].mxu1 %vm1287_vm1, %v1496_v37 }
 0x563   : > { %v1963_v42 = vpop.f32.mrb[32].mxu1 }
 0x564   : > { %v1583_v43 = vadd.f32 %v1963_v42, %v1879_v40  ;;  %v1574_v44 = vpop.f32.mrb[33].mxu1 }
 0x565   : > { %v1575_v45 = vadd.f32 %v1879_v40, %v1574_v44  ;;  %v1964_v46 = vpop.f32.mrb[34].mxu1 }
 0x566   : > { %v1655_v47 = vmul.f32 %v1626_v39, %v1583_v43  ;;  %v1586_v48 = vadd.f32 %v1964_v46, %v1879_v40  ;;  %v1577_v49 = vpop.f32.mrb[35].mxu1 }
 0x567   : > { %v1653_v51 = vmul.f32 %v1616_v41, %v1575_v45  ;;  %v1578_v52 = vadd.f32 %v1879_v40, %v1577_v49 }
 0x568   : > { %v1900_v53 = vpack.c.bf16 %v1655_v47, %v1655_v47  ;;  %v1656_v55 = vmul.f32 %v1631_v50, %v1586_v48 }
 0x569   : > { %v1898_v56 = vpack.c.bf16 %v1653_v51, %v1653_v51  ;;  %v1654_v58 = vmul.f32 %v1621_v54, %v1578_v52 }
 0x56a   : > { %1696 = vst.msk [vmem:[%s2479_s24 + $0x8] sm:$0xf] %vm1693_vm2, %v1900_v53  ;;  %v1901_v59 = vpack.c.bf16 %v1656_v55, %v1656_v55 }
 0x56b   : > { %1694 = vst.msk [vmem:[%s2479_s24] sm:$0xf] %vm1693_vm2, %v1898_v56  ;;  %v1899_v60 = vpack.c.bf16 %v1654_v58, %v1654_v58 }
 0x56c   : > { %1697 = vst.msk [vmem:[%s2479_s24 + $0xc] sm:$0xf] %vm1693_vm2, %v1901_v59 }
 0x56d   : > { %1695 = vst.msk [vmem:[%s2479_s24 + $0x4] sm:$0xf] %vm1693_vm2, %v1899_v60 }
 0x573   : > { %v1967_v63 = vpop.f32.mrb[36].mxu1 }
 0x574   : > { %v1599_v0 = vadd.f32 %v1967_v63, %v1879_v40  ;;  %v1590_v1 = vpop.f32.mrb[37].mxu1 }
 0x575   : > { %v1591_v5 = vadd.f32 %v1879_v40, %v1590_v1  ;;  %v1968_v7 = vpop.f32.mrb[38].mxu1 }
 0x576   : > { %v1659_v8 = vmul.f32 %v1646_v2, %v1599_v0  ;;  %v1602_v9 = vadd.f32 %v1968_v7, %v1879_v40  ;;  %v1593_v10 = vpop.f32.mrb[39].mxu1 }
 0x577   : > { %v1657_v11 = vmul.f32 %v1636_v61, %v1591_v5  ;;  %v1594_v12 = vadd.f32 %v1879_v40, %v1593_v10 }
 0x578   : > { %v1904_v13 = vpack.c.bf16 %v1659_v8, %v1659_v8  ;;  %v1660_v14 = vmul.f32 %v1651_v57, %v1602_v9 }
 0x579   : > { %v1902_v15 = vpack.c.bf16 %v1657_v11, %v1657_v11  ;;  %v1658_v16 = vmul.f32 %v1641_v62, %v1594_v12 }
 0x57a   : > { %1700 = vst.msk [vmem:[%s2479_s24 + $0x18] sm:$0xf] %vm1693_vm2, %v1904_v13  ;;  %v1905_v17 = vpack.c.bf16 %v1660_v14, %v1660_v14 }
 0x57b   : > { %1698 = vst.msk [vmem:[%s2479_s24 + $0x10] sm:$0xf] %vm1693_vm2, %v1902_v15  ;;  %v1903_v18 = vpack.c.bf16 %v1658_v16, %v1658_v16 }
 0x57c   : > { %1701 = vst.msk [vmem:[%s2479_s24 + $0x1c] sm:$0xf] %vm1693_vm2, %v1905_v17 }
 0x57d   : > { %1699 = vst.msk [vmem:[%s2479_s24 + $0x14] sm:$0xf] %vm1693_vm2, %v1903_v18 }
 0x57e PF: > { %s24_s29 = sadd.s32 1, %s2091_s29  }
 0x57f   : > { %p21_p4 = scmp.ge.s32.totalorder %s24_s29, 10  }
 0x581   :  { %23 = sbr.rel (!%p21_p4) target bundleno = 1 (0x1), region = 109 }

</bundles_post_ra>
